<compile_context>
chip_gen: v6e
topology: v6e:2x2x1
jax: 0.10.0
libtpu: 0.0.40
codegen_flags: <defaults>
</compile_context>

<pallas_src>
import functools

import jax
import jax.numpy as jnp
from jax.experimental import pallas as pl
from jax.experimental.pallas import tpu as pltpu


def _round_up(x, m):
    return (x + m - 1) // m * m


def _tpu_generation():
    """Return (vmem_capacity_bytes, bf16_vector_units, two_tensorcores).

    Conservative fallbacks: 64 MiB VMEM, f32-only vector path, assume 2 TCs
    (splitting the grid on a 1-TC chip only costs one extra grid step).
    """
    vmem_cap, bf16_vec, two_tc = 64 * 1024 * 1024, False, True
    try:
        kind = jax.devices()[0].device_kind.lower()
    except Exception:
        return vmem_cap, bf16_vec, two_tc
    if "v5" in kind:
        vmem_cap, bf16_vec, two_tc = 128 * 1024 * 1024, False, False
    elif "v6" in kind:
        vmem_cap, bf16_vec, two_tc = 128 * 1024 * 1024, True, False
    elif "v7" in kind:
        vmem_cap, bf16_vec, two_tc = 64 * 1024 * 1024, True, True
    return vmem_cap, bf16_vec, two_tc


def _mlp_kernel(n_layers, bf16_act, x_ref, *refs):
    """Fused MLP over one batch tile (or the whole batch on the tiny path).

    refs = (w0, b0, w1, b1, ..., w_{L-1}, b_{L-1}, out_ref).
    Weights are bf16 (MXU inputs); biases and accumulation are f32.
    Inter-layer tanh runs in bf16 when the chip's VPU/EUP support it.
    """
    out_ref = refs[-1]
    param_refs = refs[:-1]

    h = x_ref[...]
    if h.dtype != jnp.bfloat16:            # trace-time check (tiny path gets f32 x)
        h = h.astype(jnp.bfloat16)
    for i in range(n_layers):
        w = param_refs[2 * i][...]         # bf16 [in_i, out_i]
        b = param_refs[2 * i + 1][...]     # f32  [1, out_i]
        y = jnp.dot(h, w, preferred_element_type=jnp.float32) + b   # f32 acc + bias
        if i < n_layers - 1:
            if bf16_act:
                h = jnp.tanh(y.astype(jnp.bfloat16))   # bf16 VPU/EUP (v6e/v7x)
            else:
                h = jnp.tanh(y).astype(jnp.bfloat16)   # f32 EUP (v5e-safe)
        else:
            out_ref[...] = jnp.tanh(y).astype(out_ref.dtype)


def continuous_policy_forward(x, params, *, single_launch_max_batch=128):
    """x: [B, input_dim] f32; params: list of (W [in,out] f32, b [1,out] f32)."""
    n_layers = len(params)
    B, in_dim = x.shape
    out_dim = params[-1][0].shape[1]
    dims = [in_dim] + [w.shape[1] for (w, _) in params]

    vmem_cap, bf16_act, two_tc = _tpu_generation()
    kernel = functools.partial(_mlp_kernel, n_layers, bf16_act)

    flops = 2 * B * sum(dims[i] * dims[i + 1] for i in range(n_layers))
    transcendentals = B * sum(dims[1:])

    # ------------------------------------------------------------------ tiny
    # Real MADDPG actor batches (B ~ 2-32): single launch, no pad, no slice.
    if B <= single_launch_max_batch:
        flat = []
        for w, b in params:
            flat.append(w.astype(jnp.bfloat16))
            flat.append(b.astype(jnp.float32))
        param_bytes = sum(int(p.size) * p.dtype.itemsize for p in flat)
        bytes_accessed = int(x.size) * x.dtype.itemsize + param_bytes + B * out_dim * 4
        return pl.pallas_call(
            kernel,
            out_shape=jax.ShapeDtypeStruct((B, out_dim), jnp.float32),
            compiler_params=pltpu.CompilerParams(vmem_limit_bytes=32 * 1024 * 1024),
            cost_estimate=pl.CostEstimate(flops=flops,
                                          transcendentals=transcendentals,
                                          bytes_accessed=bytes_accessed),
        )(x, *flat)

    # ----------------------------------------------------------------- tiled
    out_pad = _round_up(out_dim, 128)      # lane-dense (unmasked) output stores
    flat = []
    for li, (w, b) in enumerate(params):
        if li == n_layers - 1 and out_pad != out_dim:
            w = jnp.pad(w, ((0, 0), (0, out_pad - out_dim)))   # tanh(0)=0 -> inert
            b = jnp.pad(b, ((0, 0), (0, out_pad - out_dim)))
        flat.append(w.astype(jnp.bfloat16))
        flat.append(b.astype(jnp.float32))
    param_bytes = sum(int(p.size) * p.dtype.itemsize for p in flat)
    max_dim = max(dims + [out_pad])

    # Batch tile: multiple of 16 (bf16 packs 16 rows/vreg); generation-aware
    # ceiling; sized so double-buffered bf16 x/out tiles + (2x-buffered) params
    # + live f32 activations fit VMEM; capped at ~half the batch on dual-TC
    # chips so dimension_semantics=("parallel",) actually uses both cores.
    b16 = _round_up(B, 16)
    tile_cap = 2048 if vmem_cap >= 96 * 1024 * 1024 else 1024
    row_bytes = 2 * in_dim * 2 + 2 * out_pad * 2 + 4 * max_dim * 4
    budget = min(vmem_cap // 2, 64 * 1024 * 1024)
    avail = max(budget - 2 * param_bytes, 1 * 1024 * 1024)
    tile_b = min(tile_cap, max((avail // row_bytes) // 16 * 16, 16), b16)
    if two_tc and b16 >= 32:
        tile_b = min(tile_b, _round_up((b16 + 1) // 2, 16))

    b_pad = _round_up(B, tile_b)
    x_p = x.astype(jnp.bfloat16)           # halve input HBM->VMEM stream
    if b_pad != B:
        x_p = jnp.pad(x_p, ((0, b_pad - B), (0, 0)))
    grid = (b_pad // tile_b,)

    const_map = lambda i: (0, 0)
    in_specs = [pl.BlockSpec((tile_b, in_dim), lambda i: (i, 0))]
    # Params are whole-array blocks with constant index_maps (resident in VMEM).
    # Pallas still allocates two buffers per input spec, so they are counted 2x
    # below; if wide layers ever make VMEM tight, pipeline_mode=pl.Buffered(1)
    # on these specs reclaims the second buffer.
    in_specs += [pl.BlockSpec(p.shape, const_map) for p in flat]
    out_specs = pl.BlockSpec((tile_b, out_pad), lambda i: (i, 0))

    vmem_need = (2 * tile_b * in_dim * 2          # double-buffered bf16 x tiles
                 + 2 * tile_b * out_pad * 2       # double-buffered bf16 out tiles
                 + 2 * param_bytes                # double-buffered params
                 + 4 * tile_b * max_dim * 4)      # live f32 intermediates
    vmem_limit = int(min(max(2 * vmem_need, 32 * 1024 * 1024),
                         vmem_cap - 16 * 1024 * 1024))

    bytes_accessed = b_pad * in_dim * 2 + param_bytes + b_pad * out_pad * 2

    out = pl.pallas_call(
        kernel,
        out_shape=jax.ShapeDtypeStruct((b_pad, out_pad), jnp.bfloat16),
        grid=grid,
        in_specs=in_specs,
        out_specs=out_specs,
        compiler_params=pltpu.CompilerParams(
            dimension_semantics=("parallel",),    # shard batch over TCs (v7x)
            vmem_limit_bytes=vmem_limit),
        cost_estimate=pl.CostEstimate(flops=flops,
                                      transcendentals=transcendentals,
                                      bytes_accessed=bytes_accessed),
    )(x_p, *flat)
    return out[:B, :out_dim].astype(jnp.float32)


def init_params(key, input_dim, output_dim, layers):
    """Deterministic init mimicking torch.nn.Linear default (U[-1/sqrt(fan_in), +])."""
    dims = [input_dim] + list(layers) + [output_dim]
    params = []
    for i in range(len(dims) - 1):
        fan_in, fan_out = dims[i], dims[i + 1]
        key, kw, kb = jax.random.split(key, 3)
        bound = 1.0 / (fan_in ** 0.5)
        # torch Linear stores W as [out, in]; we pre-transpose to [in, out].
        w = jax.random.uniform(kw, (fan_in, fan_out), jnp.float32, -bound, bound)
        b = jax.random.uniform(kb, (1, fan_out), jnp.float32, -bound, bound)
        params.append((w, b))
    return params


def reference_forward_f32(x, params):
    """Pure f32 reference of the PyTorch module semantics."""
    h = x
    for i, (w, b) in enumerate(params):
        h = h @ w + b
        if i < len(params) - 1:
            h = jnp.tanh(h)
    return jnp.tanh(h)


def reference_forward_bf16(x, params, bf16_act=False):
    """Reference mirroring the kernel's bf16-input / f32-accumulate policy."""
    h = x.astype(jnp.bfloat16)
    y = None
    for i, (w, b) in enumerate(params):
        y = jnp.dot(h, w.astype(jnp.bfloat16), preferred_element_type=jnp.float32) + b
        if i < len(params) - 1:
            h = jnp.tanh(y.astype(jnp.bfloat16)) if bf16_act else jnp.tanh(y).astype(jnp.bfloat16)
    return jnp.tanh(y)


if __name__ == "__main__":
    key = jax.random.PRNGKey(0)
    key, kx1, kx2, kp2 = jax.random.split(key, 4)
    _, bf16_act, _ = _tpu_generation()

    # --- tiny MADDPG-style actor batch: single-launch path -------------------
    batch, input_dim, hidden, output_dim = 2, 16, [32, 32], 8
    params = init_params(key, input_dim, output_dim, hidden)
    x = jax.random.normal(kx1, (batch, input_dim), jnp.float32)

    out = jax.block_until_ready(continuous_policy_forward(x, params))
    assert out.shape == (batch, output_dim)
    assert jnp.allclose(out, reference_forward_bf16(x, params, bf16_act),
                        atol=5e-3, rtol=5e-3), "small-batch mismatch vs bf16 ref"
    assert jnp.allclose(out, reference_forward_f32(x, params),
                        atol=5e-2), "small-batch mismatch vs f32 reference"

    # --- larger batch: exercises the tiled bf16-stream path ------------------
    b_big, in_big, hid_big, out_big_dim = 390, 24, [64, 64], 8
    params2 = init_params(kp2, in_big, out_big_dim, hid_big)
    x2 = jax.random.normal(kx2, (b_big, in_big), jnp.float32)

    out2 = jax.block_until_ready(continuous_policy_forward(x2, params2))
    assert out2.shape == (b_big, out_big_dim)
    assert jnp.allclose(out2, reference_forward_bf16(x2, params2, bf16_act),
                        atol=1e-2, rtol=1e-2), "large-batch mismatch vs bf16 ref"
    assert jnp.allclose(out2, reference_forward_f32(x2, params2),
                        atol=6e-2), "large-batch mismatch vs f32 reference"

    print("KERNEL_OK")
</pallas_src>

<mosaic_0001>
module attributes {stable_mosaic.version = 11 : i64} {
  func.func @_mlp_kernel(%arg0: memref<2x16xf32, #tpu.memory_space<vmem>>, %arg1: memref<16x32xbf16, #tpu.memory_space<vmem>>, %arg2: memref<1x32xf32, #tpu.memory_space<vmem>>, %arg3: memref<32x32xbf16, #tpu.memory_space<vmem>>, %arg4: memref<1x32xf32, #tpu.memory_space<vmem>>, %arg5: memref<32x8xbf16, #tpu.memory_space<vmem>>, %arg6: memref<1x8xf32, #tpu.memory_space<vmem>>, %arg7: memref<2x8xf32, #tpu.memory_space<vmem>>) attributes {dimension_semantics = [], scalar_prefetch = 0 : i64, scratch_operands = 0 : i64, tpu.core_type = #tpu.core_type<tc>} {
    %c0 = arith.constant 0 : index
    %c0_0 = arith.constant 0 : index
    %0 = vector.load %arg0[%c0, %c0_0] : memref<2x16xf32, #tpu.memory_space<vmem>>, vector<2x16xf32>
    %1 = arith.truncf %0 : vector<2x16xf32> to vector<2x16xbf16>
    %c0_1 = arith.constant 0 : index
    %c0_2 = arith.constant 0 : index
    %2 = vector.load %arg1[%c0_1, %c0_2] : memref<16x32xbf16, #tpu.memory_space<vmem>>, vector<16x32xbf16>
    %c0_3 = arith.constant 0 : index
    %c0_4 = arith.constant 0 : index
    %3 = vector.load %arg2[%c0_3, %c0_4] : memref<1x32xf32, #tpu.memory_space<vmem>>, vector<1x32xf32>
    %cst = arith.constant dense<0.000000e+00> : vector<2x32xf32>
    %4 = tpu.matmul %1, %2, %cst {dimension_numbers = #tpu.dot_dimension_numbers<[1], [0], [0], [1], [0, 0, 1, 1], [], []>} : vector<2x16xbf16>, vector<16x32xbf16>, vector<2x32xf32> -> vector<2x32xf32>
    %5 = vector.broadcast %3 : vector<1x32xf32> to vector<2x32xf32>
    %6 = arith.addf %4, %5 : vector<2x32xf32>
    %7 = math.tanh %6 : vector<2x32xf32>
    %8 = arith.truncf %7 : vector<2x32xf32> to vector<2x32xbf16>
    %c0_5 = arith.constant 0 : index
    %c0_6 = arith.constant 0 : index
    %9 = vector.load %arg3[%c0_5, %c0_6] : memref<32x32xbf16, #tpu.memory_space<vmem>>, vector<32x32xbf16>
    %c0_7 = arith.constant 0 : index
    %c0_8 = arith.constant 0 : index
    %10 = vector.load %arg4[%c0_7, %c0_8] : memref<1x32xf32, #tpu.memory_space<vmem>>, vector<1x32xf32>
    %cst_9 = arith.constant dense<0.000000e+00> : vector<2x32xf32>
    %11 = tpu.matmul %8, %9, %cst_9 {dimension_numbers = #tpu.dot_dimension_numbers<[1], [0], [0], [1], [0, 0, 1, 1], [], []>} : vector<2x32xbf16>, vector<32x32xbf16>, vector<2x32xf32> -> vector<2x32xf32>
    %12 = vector.broadcast %10 : vector<1x32xf32> to vector<2x32xf32>
    %13 = arith.addf %11, %12 : vector<2x32xf32>
    %14 = math.tanh %13 : vector<2x32xf32>
    %15 = arith.truncf %14 : vector<2x32xf32> to vector<2x32xbf16>
    %c0_10 = arith.constant 0 : index
    %c0_11 = arith.constant 0 : index
    %16 = vector.load %arg5[%c0_10, %c0_11] : memref<32x8xbf16, #tpu.memory_space<vmem>>, vector<32x8xbf16>
    %c0_12 = arith.constant 0 : index
    %c0_13 = arith.constant 0 : index
    %17 = vector.load %arg6[%c0_12, %c0_13] : memref<1x8xf32, #tpu.memory_space<vmem>>, vector<1x8xf32>
    %cst_14 = arith.constant dense<0.000000e+00> : vector<2x8xf32>
    %18 = tpu.matmul %15, %16, %cst_14 {dimension_numbers = #tpu.dot_dimension_numbers<[1], [0], [0], [1], [0, 0, 1, 1], [], []>} : vector<2x32xbf16>, vector<32x8xbf16>, vector<2x8xf32> -> vector<2x8xf32>
    %19 = vector.broadcast %17 : vector<1x8xf32> to vector<2x8xf32>
    %20 = arith.addf %18, %19 : vector<2x8xf32>
    %21 = math.tanh %20 : vector<2x8xf32>
    %c0_15 = arith.constant 0 : index
    %c0_16 = arith.constant 0 : index
    %22 = vector.load %arg7[%c0_15, %c0_16] : memref<2x8xf32, #tpu.memory_space<vmem>>, vector<2x8xf32>
    tpu.vector_store %arg7[%c0_15, %c0_16], %21 {strides = array<i32>} : memref<2x8xf32, #tpu.memory_space<vmem>>, vector<2x8xf32>,
    return
  }
}

</mosaic_0001>

<bundles_post_ra>
// kernel: tpu_custom_call.1
= control target key start
LH: loop header
LB: loop body
LE: loop exit
PB: predicated region body
PF: predicated region fallthrough
CT: control target
= control target key end

     0   :  { %12 = vsyncpa [#allocation3], 0  ;;  %s469_s0 = inlined_call_operand.hbm [shape: f32[2,16], index: 0, kind: input, shape index: {}]   ;;  %s470_s1 = inlined_call_operand.vmem [shape: bf16[16,32], index: 1, kind: input, shape index: {}]   ;;  %s471_s2 = inlined_call_operand.vmem [shape: f32[1,32], index: 2, kind: input, shape index: {}]   ;;  %s472_s3 = inlined_call_operand.vmem [shape: bf16[32,32], index: 3, kind: input, shape index: {}]   ;;  %s473_s4 = inlined_call_operand.hbm [shape: f32[1,32], index: 4, kind: input, shape index: {}]   ;;  %s474_s5 = inlined_call_operand.vmem [shape: bf16[32,8], index: 5, kind: input, shape index: {}]   ;;  %s475_s6 = inlined_call_operand.vmem [shape: f32[1,8], index: 6, kind: input, shape index: {}]   ;;  %s476_s7 = inlined_call_operand.hbm [shape: f32[2,8], index: 7, kind: output, shape index: {}]  }
   0x1   :  { %13 = vsyncpa [#allocation6], 0 }
   0x2   :  { %14 = vsyncpa [#allocation4], 0  ;;  %s392_s24 = smov [#allocation2]   ;;  %s393_s26 = smov [#allocation5]  }
   0x3   :  { %s21_s25 = sshll.u32 %s392_s24, 4  ;;  %s37_s27 = sshll.u32 %s393_s26, 4  ;;  %s22_s25 = int_to_ptr.vmem [resolvable:$true] %s21_s25  ;;  %s38_s27 = int_to_ptr.vmem [resolvable:$true] %s37_s27 }
   0x4   :  { %s334_s28 = scalar_lea.vmem %s22_s25, 32  ;;  %p339_p1 = scmp.lt.s32.totalorder %s22_s25, %s22_s25 }
   0x5   :  { %p335_p0 = scmp.ne.s32.totalorder %s22_s25, %s334_s28  ;;  %p340_p2 = scmp.lt.s32.totalorder %s334_s28, %s334_s28 }
   0x7   :  { %p341_p3 = por %p340_p2, %p339_p1 }
   0x9   :  { %p342_p4 = pnand %p341_p3, %p335_p0 }
   0xb   :  { %345 = shalt.err (!%p342_p4)
}
   0xc   :  { %24 = dma.hbm_to_vmem [thread:$0]  %s469_s0, 32, %s22_s25, [#allocation3]  }
   0xd   :  { %s354_s8 = scalar_lea.vmem %s38_s27, 16  ;;  %s358_s9 = scalar_lea.vmem %s38_s27, 32 }
   0xe   :  { %p355_p5 = scmp.ne.s32.totalorder %s38_s27, %s354_s8  ;;  %p359_p6 = scmp.lt.s32.totalorder %s38_s27, %s38_s27 }
   0xf   :  { %p360_p7 = scmp.lt.s32.totalorder %s358_s9, %s354_s8 }
  0x11   :  { %p361_p8 = por %p360_p7, %p359_p6 }
  0x13   :  { %p362_p9 = pnand %p361_p8, %p355_p5 }
  0x15   :  { %365 = shalt.err (!%p362_p9)
}
  0x16   :  { %40 = dma.hbm_to_vmem [thread:$0]  %s473_s4, 16, %s38_s27, [#allocation6]  }
  0x17   :  { %386 = dma.done.wait [#allocation3], 32  }
  0x18   :  { %387 = vsyncadd [#allocation3], 4294967264 }
  0x19   :  { %388 = dma.done.wait [#allocation6], 16  }
  0x1a   :  { %389 = vsyncadd [#allocation6], 4294967280  ;;  %v394_v0 = vmov 0.0   ;;  %vm395_vm0 = vmmov 0   ;;  %v315_v1 = vld [vmem:[%s470_s1] sm:$0xff]   ;;  %vm69_vm1 = vcmask 130048  }
  0x1b   :  { %288 = vmatprep.subr.bf16.mxu0 %v394_v0  ;;  %290 = vmatprep.mubr.msk.bf16.mxu0 %vm395_vm0, %v394_v0  ;;  %v52_v2 = vld [vmem:[#allocation2] sm:$0x3]  ;;  %v316_v4 = vld [vmem:[%s472_s3 + $0x8] sm:$0xff]   ;;  %vm138_vm2 = vcmask 261120   ;;  %v272_v16 = vld [vmem:[#allocation5] ss:$0 sm:$0xff] }
  0x1c   :  { %294 = vmatprep.subr.bf16.mxu1 %v394_v0  ;;  %298 = vmatprep.mubr.msk.bf16.mxu1 %vm395_vm0, %v394_v0  ;;  %v53_v3 = vpack.c.bf16 %v52_v2, %v52_v2  ;;  %v317_v5 = vld [vmem:[%s472_s3] sm:$0xff]   ;;  %v318_v14 = vld [vmem:[%s474_s5 + $0x8] sm:$0xff]   ;;  %vm251_vm3 = vcmask 58368  }
  0x1d   :  { %289 = vmatpush3.bf16.msra.mxu0 %v315_v1  ;;  %295 = vmatpush3.bf16.msra.mxu1 %v316_v4  ;;  %v269_v6 = vld [vmem:[%s471_s2] ss:$0 sm:$0xff] }
  0x1e   :  { %302 = vmatprep.subr.bf16.mxu0 %v394_v0  ;;  %296 = vmatprep.subr.bf16.mxu1 %v394_v0  ;;  %v319_v15 = vld [vmem:[%s474_s5] sm:$0xff]   ;;  %s396_s5 = smov [#allocation7]  }
  0x1f   :  { %v276_v24 = vld [vmem:[%s475_s6] ss:$0 sm:$0xff]  ;;  %s259_s21 = sshll.u32 %s396_s5, 4  ;;  %s260_s21 = int_to_ptr.vmem [resolvable:$true] %s259_s21 }
  0x20   :  { %291 = vmatmul.mubr.msk.bf16.vlgmr.msra.gmra.mxu0 %vm69_vm1, %v53_v3  ;;  %s366_s22 = scalar_lea.vmem %s260_s21, 32  ;;  %p371_p11 = scmp.lt.s32.totalorder %s260_s21, %s260_s21 }
  0x21   :  { %306 = vmatprep.mubr.msk.bf16.mxu0 %vm395_vm0, %v394_v0  ;;  %297 = vmatpush3.bf16.msra.mxu1 %v317_v5  ;;  %p367_p10 = scmp.ne.s32.totalorder %s260_s21, %s366_s22  ;;  %p372_p12 = scmp.lt.s32.totalorder %s366_s22, %s366_s22 }
  0x22   :  { %303 = vmatpush3.bf16.msra.mxu0 %v318_v14 }
  0x23   :  { %304 = vmatprep.subr.bf16.mxu0 %v394_v0  ;;  %p373_p13 = por %p372_p12, %p371_p11 }
  0x25   :  { %p374_p0 = pnand %p373_p13, %p367_p10 }
  0x26   :  { %305 = vmatpush3.bf16.msra.mxu0 %v319_v15 }
  0xe0   :  { %v107_v7 = vpop.f32.mrf.mxu0 }
  0xe1   :  { %v108_v8 = vadd.f32 %v269_v6, %v107_v7 }
  0xe2   :  { %v292_v9 = vpop.f32.mrf.mxu0 }
  0xe3   :  { %320 = vtanh.f32 %v108_v8 }
  0xe4   :  { %v110_v10 = vpop.f32.mrf.mxu0 }
  0xe6   :  { %v293_v11 = vpop.f32.mrf.mxu0 }
  0xf0   :  { %v321_v12 = vpop.eup %320 }
  0xf1   :  { %v114_v13 = vpack.c.bf16 %v321_v12, %v321_v12 }
  0xf3   :  { %299 = vmatmul.mubr.msk.bf16.vlgmr.msra.gmra.mxu1 %vm138_vm2, %v114_v13 }
 0x1b3   :  { %v176_v17 = vpop.f32.mrf.mxu1 }
 0x1b4   :  { %v177_v18 = vadd.f32 %v272_v16, %v176_v17 }
 0x1b5   :  { %v300_v19 = vpop.f32.mrf.mxu1 }
 0x1b6   :  { %322 = vtanh.f32 %v177_v18 }
 0x1b7   :  { %v179_v20 = vpop.f32.mrf.mxu1 }
 0x1b9   :  { %v301_v21 = vpop.f32.mrf.mxu1 }
 0x1c3   :  { %v323_v22 = vpop.eup %322 }
 0x1c4   :  { %v183_v23 = vpack.c.bf16 %v323_v22, %v323_v22 }
 0x1c6   :  { %307 = vmatmul.mubr.msk.bf16.vlgmr.msra.gmra.mxu0 %vm138_vm2, %v183_v23 }
 0x286   :  { %v244_v25 = vpop.f32.mrf.mxu0 }
 0x287   :  { %v245_v26 = vadd.f32 %v276_v24, %v244_v25 }
 0x288   :  { %v308_v27 = vpop.f32.mrf.mxu0 }
 0x289   :  { %324 = vtanh.f32 %v245_v26 }
 0x28a   :  { %v247_v28 = vpop.f32.mrf.mxu0 }
 0x28c   :  { %v309_v29 = vpop.f32.mrf.mxu0 }
 0x296   :  { %v325_v30 = vpop.eup %324 }
 0x297   :  { %252 = vst.msk [vmem:[#allocation7] sm:$0x3] %vm251_vm3, %v325_v30 }
 0x298   :  { %377 = shalt.err (!%p374_p0)
}
 0x299   :  { %262 = dma.vmem_to_hbm [thread:$0]  %s260_s21, 32, %s476_s7, [#allocation4]  }
 0x29a   :  { %390 = dma.done.wait [#allocation4], 32  }
 0x29b   :  { %391 = vsyncadd [#allocation4], 4294967264 }
 0x29c   :  { %266 = vsyncpa [#allocation3], 1 }
 0x29d   :  { %267 = vsyncpa [#allocation6], 1 }
 0x29e   :  { %268 = vsyncpa [#allocation4], 1 }

</bundles_post_ra>
